<compile_context>
chip_gen: v6e
topology: v6e:2x2x1
jax: 0.10.0
libtpu: 0.0.40
codegen_flags: <defaults>
</compile_context>

<pallas_src>
import functools

import jax
import jax.numpy as jnp
from jax.experimental import pallas as pl
from jax.experimental.pallas import tpu as pltpu


def _triplet_kernel(a_ref, p_ref, n_ref, o_ref, *, alpha):
    # Accumulate in f32 even for bf16 inputs (the dist_pa - dist_na subtraction
    # is cancellation-prone).
    a = a_ref[...].astype(jnp.float32)
    p = p_ref[...].astype(jnp.float32)
    n = n_ref[...].astype(jnp.float32)
    # dist_pa - dist_na == sum((p-a)^2 - (n-a)^2) == sum((p - n) * (p + n - 2a))
    # -> one XLU lane reduction instead of two, and fewer VALU multiplies.
    d = jnp.sum((p - n) * (p + n - 2.0 * a), axis=-1, keepdims=True)  # (tb, 1) f32
    loss = jnp.maximum(d + jnp.float32(alpha), 0.0)                   # relu
    # Lane-dense store: (tb, 1) column -> (1, tb) row so the output write is an
    # unmasked full-lane store (the transpose rides the XLU slot).
    o_ref[...] = jnp.transpose(loss).astype(o_ref.dtype)


def triplet_loss(emb_a, emb_p, emb_n, alpha, *, block_b=4096):
    """Pallas TPU implementation of TripletLoss.forward.

    emb_a, emb_p, emb_n: (B, E) float arrays (f32 or bf16).
    Returns loss of shape (B,) with the same dtype as the inputs.
    """
    B, E = emb_a.shape
    assert emb_p.shape == (B, E) and emb_n.shape == (B, E)
    in_dtype = emb_a.dtype
    itemsize = jnp.dtype(in_dtype).itemsize

    # --- generation-aware VMEM budget ----------------------------------------
    # Query physical VMEM per TensorCore (128 MiB on v5e/v6e, 64 MiB on v7x);
    # fall back to the smallest (v7x) value if the query is unavailable.
    try:
        vmem_cap = int(pltpu.get_tpu_info().vmem_capacity_bytes)
    except Exception:  # pragma: no cover - conservative fallback
        vmem_cap = 64 * 1024 * 1024
    # Double-buffered working-set budget: ~60% of physical, capped at 48 MiB.
    budget = min(int(vmem_cap * 0.6), 48 * 1024 * 1024)

    # Per-row VMEM footprint: 3 inputs x 2 pipeline buffers, plus an allowance
    # for the in-kernel f32-upcast temporaries, plus the tiny output row.
    per_row = 2 * 3 * E * itemsize + 3 * E * 4 + 16

    # --- batch-tile (tb) selection --------------------------------------------
    # Big tiles amortize the ~0.35 us/step pipeline overhead; each step should
    # move multiple MiB of input (block_b=4096 @ E=128 f32 -> ~6 MiB/step).
    b_round = ((B + 127) // 128) * 128
    tb_cap = (budget // per_row) // 128 * 128
    if B <= 128:
        # Single exact block (block == array): no partial-block handling at all.
        tb = B
    else:
        tb = min(block_b, tb_cap, b_round)
        tb = max(128, (tb // 128) * 128)
    # TODO(synk): for very wide embeddings (E so large that even a 128-row
    # double-buffered block exceeds VMEM, e.g. E >~ 20K f32 on v7x) add an
    # E-axis "arbitrary" grid dimension with a (tb, 1) f32 accumulator scratch
    # and pl.when init/finalize instead of relying on the vmem_limit raise.

    grid = pl.cdiv(B, tb)

    # Scoped-VMEM limit: cover the chosen working set with headroom, stay well
    # under physical capacity (64 MiB on v7x).
    vmem_limit = int(min(vmem_cap - (2 << 20),
                         max(32 << 20, tb * per_row + (4 << 20))))

    in_spec = pl.BlockSpec((tb, E), lambda i: (i, 0))
    out_spec = pl.BlockSpec((1, tb), lambda i: (0, i))   # lane-dense output row

    out = pl.pallas_call(
        functools.partial(_triplet_kernel, alpha=float(alpha)),
        out_shape=jax.ShapeDtypeStruct((1, B), jnp.float32),
        grid_spec=pltpu.PrefetchScalarGridSpec(
            num_scalar_prefetch=0,
            grid=(grid,),
            in_specs=[in_spec, in_spec, in_spec],
            out_specs=out_spec,
        ),
        compiler_params=pltpu.CompilerParams(
            dimension_semantics=("parallel",),
            vmem_limit_bytes=vmem_limit,
        ),
        cost_estimate=pl.CostEstimate(
            flops=6 * B * E,
            transcendentals=0,
            bytes_accessed=3 * B * E * itemsize + B * 4,
        ),
    )(emb_a, emb_p, emb_n)

    return out.reshape(B).astype(in_dtype)


def _reference(emb_a, emb_p, emb_n, alpha):
    a = emb_a.astype(jnp.float32)
    p = emb_p.astype(jnp.float32)
    n = emb_n.astype(jnp.float32)
    d_pa = jnp.sum((p - a) ** 2, axis=-1)
    d_na = jnp.sum((n - a) ** 2, axis=-1)
    return jnp.maximum(d_pa - d_na + alpha, 0.0)


if __name__ == "__main__":
    alpha = 0.2
    root = jax.random.PRNGKey(0)

    # Case 1: tiny batch / narrow embedding (B <= 128 -> one exact block).
    ka, kp, kn = jax.random.split(jax.random.fold_in(root, 1), 3)
    B, E = 6, 96
    a = jax.random.normal(ka, (B, E), dtype=jnp.float32)
    p = jax.random.normal(kp, (B, E), dtype=jnp.float32)
    n = jax.random.normal(kn, (B, E), dtype=jnp.float32)
    loss = jax.block_until_ready(triplet_loss(a, p, n, alpha))
    assert loss.shape == (B,)
    assert jnp.allclose(loss, _reference(a, p, n, alpha), atol=1e-5, rtol=1e-5)

    # Case 2a: non-multiple batch, default tile (single partial block, no pad).
    ka, kp, kn = jax.random.split(jax.random.fold_in(root, 2), 3)
    B, E = 300, 128
    a = jax.random.normal(ka, (B, E), dtype=jnp.float32)
    p = jax.random.normal(kp, (B, E), dtype=jnp.float32)
    n = jax.random.normal(kn, (B, E), dtype=jnp.float32)
    loss = jax.block_until_ready(triplet_loss(a, p, n, alpha))
    assert loss.shape == (B,)
    assert jnp.allclose(loss, _reference(a, p, n, alpha), atol=1e-4, rtol=1e-4)

    # Case 2b: force a multi-step grid (grid = 3) with a partial last block.
    loss_small_tile = jax.block_until_ready(
        triplet_loss(a, p, n, alpha, block_b=128))
    assert loss_small_tile.shape == (B,)
    assert jnp.allclose(loss_small_tile, _reference(a, p, n, alpha),
                        atol=1e-4, rtol=1e-4)

    # Case 3: bf16 inputs -- kernel accumulates in f32, output cast back to bf16.
    ab, pb, nb = (x.astype(jnp.bfloat16) for x in (a, p, n))
    loss16 = jax.block_until_ready(triplet_loss(ab, pb, nb, alpha))
    assert loss16.shape == (B,) and loss16.dtype == jnp.bfloat16
    ref16 = _reference(ab, pb, nb, alpha)
    assert jnp.allclose(loss16.astype(jnp.float32), ref16, atol=5e-2, rtol=5e-2)

    print("KERNEL_OK")
</pallas_src>

<mosaic_0001>
module attributes {stable_mosaic.version = 11 : i64} {
  func.func @_triplet_kernel(%arg0: i32, %arg1: memref<6x96xf32, #tpu.memory_space<vmem>>, %arg2: memref<6x96xf32, #tpu.memory_space<vmem>>, %arg3: memref<6x96xf32, #tpu.memory_space<vmem>>, %arg4: memref<1x6xf32, #tpu.memory_space<vmem>>) attributes {dimension_semantics = [#tpu.dimension_semantics<parallel>], iteration_bounds = array<i64: 1>, scalar_prefetch = 0 : i64, scratch_operands = 0 : i64, tpu.core_type = #tpu.core_type<tc>, window_params = [{transform_indices = @transform_0, window_bounds = array<i64: 6, 96>}, {transform_indices = @transform_1, window_bounds = array<i64: 6, 96>}, {transform_indices = @transform_2, window_bounds = array<i64: 6, 96>}, {transform_indices = @transform_3, window_bounds = array<i64: 1, 6>}]} {
    %c0 = arith.constant 0 : index
    %c0_0 = arith.constant 0 : index
    %0 = vector.load %arg1[%c0, %c0_0] : memref<6x96xf32, #tpu.memory_space<vmem>>, vector<6x96xf32>
    %c0_1 = arith.constant 0 : index
    %c0_2 = arith.constant 0 : index
    %1 = vector.load %arg2[%c0_1, %c0_2] : memref<6x96xf32, #tpu.memory_space<vmem>>, vector<6x96xf32>
    %c0_3 = arith.constant 0 : index
    %c0_4 = arith.constant 0 : index
    %2 = vector.load %arg3[%c0_3, %c0_4] : memref<6x96xf32, #tpu.memory_space<vmem>>, vector<6x96xf32>
    %3 = arith.subf %1, %2 : vector<6x96xf32>
    %4 = arith.addf %1, %2 : vector<6x96xf32>
    %cst = arith.constant 2.000000e+00 : f32
    %5 = vector.broadcast %cst : f32 to vector<6x96xf32>
    %6 = arith.mulf %5, %0 : vector<6x96xf32>
    %7 = arith.subf %4, %6 : vector<6x96xf32>
    %8 = arith.mulf %3, %7 : vector<6x96xf32>
    %cst_5 = arith.constant dense<0.000000e+00> : vector<6xf32>
    %9 = vector.multi_reduction <add>, %8, %cst_5 [1] : vector<6x96xf32> to vector<6xf32>
    %10 = vector.shape_cast %9 : vector<6xf32> to vector<6x1xf32>
    %cst_6 = arith.constant 2.000000e-01 : f32
    %11 = vector.broadcast %cst_6 : f32 to vector<6x1xf32>
    %12 = arith.addf %10, %11 : vector<6x1xf32>
    %cst_7 = arith.constant 0.000000e+00 : f32
    %13 = vector.broadcast %cst_7 : f32 to vector<6x1xf32>
    %14 = arith.maximumf %12, %13 : vector<6x1xf32>
    %15 = tpu.transpose %14, [1, 0] : vector<6x1xf32> -> vector<1x6xf32>
    %c0_8 = arith.constant 0 : index
    %c0_9 = arith.constant 0 : index
    %16 = vector.load %arg4[%c0_8, %c0_9] : memref<1x6xf32, #tpu.memory_space<vmem>>, vector<1x6xf32>
    tpu.vector_store %arg4[%c0_8, %c0_9], %15 {strides = array<i32>} : memref<1x6xf32, #tpu.memory_space<vmem>>, vector<1x6xf32>,
    return
  }
  func.func @transform_0(%arg0: i32) -> (i32, i32) {
    %c0_i32 = arith.constant 0 : i32
    %c0_i32_0 = arith.constant 0 : i32
    return %arg0, %c0_i32 : i32, i32
  }
  func.func @transform_1(%arg0: i32) -> (i32, i32) {
    %c0_i32 = arith.constant 0 : i32
    %c0_i32_0 = arith.constant 0 : i32
    return %arg0, %c0_i32 : i32, i32
  }
  func.func @transform_2(%arg0: i32) -> (i32, i32) {
    %c0_i32 = arith.constant 0 : i32
    %c0_i32_0 = arith.constant 0 : i32
    return %arg0, %c0_i32 : i32, i32
  }
  func.func @transform_3(%arg0: i32) -> (i32, i32) {
    %c0_i32 = arith.constant 0 : i32
    %c0_i32_0 = arith.constant 0 : i32
    return %c0_i32, %arg0 : i32, i32
  }
}

</mosaic_0001>

<bundles_post_ra>
// kernel: tpu_custom_call.1
= control target key start
LH: loop header
LB: loop body
LE: loop exit
PB: predicated region body
PF: predicated region fallthrough
CT: control target
= control target key end

     0   :  { %8 = vsyncpa [#allocation3], 0  ;;  %s241_s0 = inlined_call_operand.hbm [shape: f32[6,96], index: 0, kind: input, shape index: {}]   ;;  %s242_s1 = inlined_call_operand.hbm [shape: f32[6,96], index: 1, kind: input, shape index: {}]   ;;  %s243_s2 = inlined_call_operand.hbm [shape: f32[6,96], index: 2, kind: input, shape index: {}]   ;;  %s244_s3 = inlined_call_operand.hbm [shape: f32[1,6], index: 3, kind: output, shape index: {}]  }
   0x1   :  { %9 = vsyncpa [#allocation6], 0 }
   0x2   :  { %10 = vsyncpa [#allocation4], 0  ;;  %s205_s12 = smov [#allocation5]   ;;  %s206_s14 = smov [#allocation2]  }
   0x3   :  { %s27_s13 = sshll.u32 %s205_s12, 4  ;;  %s17_s15 = sshll.u32 %s206_s14, 4  ;;  %s28_s13 = int_to_ptr.vmem [resolvable:$true] %s27_s13  ;;  %s18_s15 = int_to_ptr.vmem [resolvable:$true] %s17_s15 }
   0x4   :  { %s127_s16 = scalar_lea.vmem %s28_s13, 128  ;;  %p132_p1 = scmp.lt.s32.totalorder %s28_s13, %s28_s13 }
   0x5   :  { %p128_p0 = scmp.ne.s32.totalorder %s28_s13, %s127_s16  ;;  %p133_p2 = scmp.lt.s32.totalorder %s127_s16, %s127_s16 }
   0x7   :  { %p134_p3 = por %p133_p2, %p132_p1 }
   0x9   :  { %p135_p4 = pnand %p134_p3, %p128_p0 }
   0xb   :  { %138 = shalt.err (!%p135_p4)
}
   0xc   :  { %30 = dma.hbm_to_vmem [thread:$0]  %s242_s1, 128, %s28_s13, [#allocation6]  }
   0xd   :  { %s147_s19 = scalar_lea.vmem %s18_s15, 128  ;;  %p152_p6 = scmp.lt.s32.totalorder %s18_s15, %s18_s15 }
   0xe   :  { %p148_p5 = scmp.ne.s32.totalorder %s18_s15, %s147_s19  ;;  %p153_p7 = scmp.lt.s32.totalorder %s147_s19, %s147_s19 }
  0x10   :  { %p154_p8 = por %p153_p7, %p152_p6 }
  0x12   :  { %p155_p9 = pnand %p154_p8, %p148_p5 }
  0x14   :  { %158 = shalt.err (!%p155_p9)
}
  0x15   :  { %20 = dma.hbm_to_vmem [thread:$0]  %s241_s0, 128, %s18_s15, [#allocation3]  }
  0x16   :  { %s207_s22 = smov [#allocation7]  }
  0x17   :  { %s37_s23 = sshll.u32 %s207_s22, 4  ;;  %s38_s23 = int_to_ptr.vmem [resolvable:$true] %s37_s23 }
  0x18   :  { %s167_s24 = scalar_lea.vmem %s38_s23, 128  ;;  %p172_p11 = scmp.lt.s32.totalorder %s38_s23, %s38_s23 }
  0x19   :  { %p168_p10 = scmp.ne.s32.totalorder %s38_s23, %s167_s24  ;;  %p173_p12 = scmp.lt.s32.totalorder %s167_s24, %s167_s24 }
  0x1b   :  { %p174_p13 = por %p173_p12, %p172_p11 }
  0x1d   :  { %p175_p0 = pnand %p174_p13, %p168_p10 }
  0x1f   :  { %178 = shalt.err (!%p175_p0)
}
  0x20   :  { %40 = dma.hbm_to_vmem [thread:$0]  %s243_s2, 128, %s38_s23, [#allocation6]  }
  0x21   :  { %199 = dma.done.wait [#allocation3], 128  }
  0x22   :  { %200 = vsyncadd [#allocation3], 4294967168 }
  0x23   :  { %201 = dma.done.wait [#allocation6], 256  }
  0x24   :  { %202 = vsyncadd [#allocation6], 4294967040  ;;  %v50_v0 = vld [vmem:[#allocation2] sm:$0x3f]  ;;  %v51_v1 = vld [vmem:[#allocation5] sm:$0x3f] }
  0x25   :  { %v52_v2 = vld [vmem:[#allocation7] sm:$0x3f]  ;;  %v55_v5 = vmul.f32 2.0, %v50_v0  ;;  %vm58_vm0 = vcmask 783360   ;;  %s208_s0 = smov [#allocation8]   ;;  %vm96_vm1 = vcmask 40960  }
  0x26   :  { %v53_v3 = vsub.f32 %v51_v1, %v52_v2  ;;  %v54_v4 = vadd.f32 %v52_v2, %v51_v1  ;;  %s104_s2 = sshll.u32 %s208_s0, 4  ;;  %s105_s2 = int_to_ptr.vmem [resolvable:$true] %s104_s2 }
  0x27   :  { %s179_s26 = scalar_lea.vmem %s105_s2, 16  ;;  %s183_s27 = scalar_lea.vmem %s105_s2, 32 }
  0x28   :  { %v56_v6 = vsub.f32 %v54_v4, %v55_v5  ;;  %p180_p1 = scmp.ne.s32.totalorder %s105_s2, %s179_s26  ;;  %p184_p2 = scmp.lt.s32.totalorder %s105_s2, %s105_s2 }
  0x29   :  { %p185_p3 = scmp.lt.s32.totalorder %s183_s27, %s179_s26 }
  0x2a   :  { %v57_v7 = vmul.f32 %v56_v6, %v53_v3 }
  0x2b   :  { %p186_p4 = por %p185_p3, %p184_p2 }
  0x2c   :  { %v59_v8 = vsel %vm58_vm0, %v57_v7, 0.0 }
  0x2d   :  { %60 = vadd.xlane.f32.xlu0 %v59_v8  ;;  %p187_p5 = pnand %p186_p4, %p180_p1 }
  0xb6   :  { %v61_v9 = vpop.xlane.xlu0 %60 }
  0xb7   :  { %v62_v10 = vadd.f32 0.2, %v61_v9 }
  0xb9   :  { %v63_v11 = vmax.f32 %v62_v10, 0.0 }
  0xbb   :  { %64 = vxpose.xlu0.b32.start.end [1/1] (short) (narrow) %v63_v11, 8 }
 0x137   :  { %v80_v12 = vpop.trf.xlu0 }
 0x138   :  { %97 = vst.msk [vmem:[#allocation8] sm:$0x1] %vm96_vm1, %v80_v12 }
 0x139   :  { %190 = shalt.err (!%p187_p5)
}
 0x13a   :  { %107 = dma.vmem_to_hbm [thread:$0]  %s105_s2, 16, %s244_s3, [#allocation4]  }
 0x13b   :  { %203 = dma.done.wait [#allocation4], 16  }
 0x13c   :  { %204 = vsyncadd [#allocation4], 4294967280 }
 0x13d   :  { %111 = vsyncpa [#allocation3], 1 }
 0x13e   :  { %112 = vsyncpa [#allocation6], 1 }
 0x13f   :  { %113 = vsyncpa [#allocation4], 1 }

</bundles_post_ra>
